<compile_context>
chip_gen: v6e
topology: v6e:2x2x1
jax: 0.10.0
libtpu: 0.0.40
codegen_flags: <defaults>
</compile_context>

<pallas_src>
import functools
import math

import jax
import jax.numpy as jnp
import numpy as np
from jax.experimental import pallas as pl
from jax.experimental.pallas import tpu as pltpu


# --------------------------------------------------------------------------- tiling
def _round_up(x, m):
    return (x + m - 1) // m * m


def _pick_tile(dim, preferred, align):
    """Largest `align`-multiple <= preferred that divides dim, else full dim."""
    if dim <= preferred:
        return dim
    t = (preferred // align) * align
    while t >= align:
        if dim % t == 0:
            return t
        t -= align
    return dim


def _tile_and_pad(dim, preferred, align):
    """(tile, padded_dim): full dim if small, else align-multiple tile + padding."""
    if dim <= preferred:
        return dim, dim
    t = max(align, (preferred // align) * align)
    return t, _round_up(dim, t)


# --------------------------------------------------------------------------- kernels
def _linear_kernel(x_ref, w_ref, b_ref, o_ref, acc_ref):
    """One (tm, tn) output tile; grid axis 2 (K) is the reduction."""
    k = pl.program_id(2)

    @pl.when(k == 0)
    def _init():
        # bias goes straight into the f32 accumulator -> no epilogue add.
        acc_ref[...] = jnp.broadcast_to(b_ref[...], acc_ref.shape)

    acc_ref[...] += jnp.dot(x_ref[...], w_ref[...],
                            preferred_element_type=jnp.float32)

    @pl.when(k == pl.num_programs(2) - 1)
    def _finalize():
        o_ref[...] = acc_ref[...].astype(o_ref.dtype)


def _flash_attn_kernel(q_ref, k_ref, v_ref, o_ref, lse_ref, m_s, l_s, acc_s,
                       *, exact_recip):
    """Online-softmax attention; all heads of one (batch, q-tile) per step.

    q_ref   : (tq,  H, D) bf16
    k_ref   : (skv, H, D) bf16
    v_ref   : (skv, H, D) bf16
    o_ref   : (tq, E=H*D) bf16  lane-dense output slab
    lse_ref : (H, tq, 1)  f32   per-head log-sum-exp (for the weights kernel)
    m_s/l_s : (H, tq, 1)  f32   running max / running sum scratch
    acc_s   : (H, tq, D)  f32   running PV accumulator
    """
    ki = pl.program_id(2)

    @pl.when(ki == 0)
    def _init():
        m_s[...] = jnp.full_like(m_s, -jnp.inf)
        l_s[...] = jnp.zeros_like(l_s)
        acc_s[...] = jnp.zeros_like(acc_s)

    q = q_ref[...]
    k = k_ref[...]
    v = v_ref[...]

    # (H, tq, skv) scores; batch over H in the dot -> no Q/K/V transposes.
    # (1/sqrt(head_dim) is already folded into the Q projection weights.)
    s = jnp.einsum("thd,shd->hts", q, k, preferred_element_type=jnp.float32)

    m_prev = m_s[...]
    m_new = jnp.maximum(m_prev, jnp.max(s, axis=-1, keepdims=True))
    alpha = jnp.exp(m_prev - m_new)
    p = jnp.exp(s - m_new)                                    # (H, tq, skv) f32
    l_s[...] = alpha * l_s[...] + jnp.sum(p, axis=-1, keepdims=True)
    acc_s[...] = alpha * acc_s[...] + jnp.einsum(
        "hts,shd->htd", p.astype(v.dtype), v, preferred_element_type=jnp.float32)
    m_s[...] = m_new

    @pl.when(ki == pl.num_programs(2) - 1)
    def _finalize():
        h, _, d = acc_s.shape
        l = l_s[...]
        inv_l = pl.reciprocal(l, approx=not exact_recip)      # exact by default
        # per-head stores into the lane-dense (tq, E) output slab.
        for hh in range(h):
            o_ref[:, hh * d:(hh + 1) * d] = (acc_s[hh] * inv_l[hh]).astype(o_ref.dtype)
        lse_ref[...] = m_s[...] + jnp.log(l)


def _attn_weights_kernel(q_ref, k_ref, lse_ref, w_ref, *, inv_heads):
    """Head-averaged softmax probabilities for one (b, q-tile, kv-tile) block."""
    s = jnp.einsum("thd,shd->hts", q_ref[...], k_ref[...],
                   preferred_element_type=jnp.float32)        # (H, tq, skv)
    p = jnp.exp(s - lse_ref[...])                             # exact softmax
    w_ref[...] = (jnp.sum(p, axis=0) * inv_heads).astype(w_ref.dtype)


# --------------------------------------------------------------------------- wrappers
def pallas_linear(x, w_t, b, out_dtype, *, tm=256, tn=512, tk=512):
    """y = x @ w_t + b.  x: (N, Din), w_t: (Din, Dout), b: (Dout,).

    Tiled bf16 MXU matmul with an f32 VMEM accumulator.  All three dims are
    padded to tile multiples (no silent full-dim block fallback); X is cast
    to bf16 before the call so its tile DMAs are half-width.
    """
    n, din = x.shape
    dout = w_t.shape[1]

    tm, n_p = _tile_and_pad(n, tm, 16)        # 16-aligned: bf16 sublane packing
    tn, dout_p = _tile_and_pad(dout, tn, 128)
    tk, din_p = _tile_and_pad(din, tk, 128)

    x = x.astype(jnp.bfloat16)
    w_t = w_t.astype(jnp.bfloat16)
    b2 = b.astype(jnp.float32).reshape(1, dout)
    if (n_p, din_p) != (n, din):
        x = jnp.pad(x, ((0, n_p - n), (0, din_p - din)))
    if (din_p, dout_p) != (din, dout):
        w_t = jnp.pad(w_t, ((0, din_p - din), (0, dout_p - dout)))
    if dout_p != dout:
        b2 = jnp.pad(b2, ((0, 0), (0, dout_p - dout)))

    out = pl.pallas_call(
        _linear_kernel,
        out_shape=jax.ShapeDtypeStruct((n_p, dout_p), out_dtype),
        grid=(n_p // tm, dout_p // tn, din_p // tk),
        in_specs=[
            pl.BlockSpec((tm, tk), lambda i, j, k: (i, k)),
            pl.BlockSpec((tk, tn), lambda i, j, k: (k, j)),
            pl.BlockSpec((1, tn), lambda i, j, k: (0, j)),
        ],
        out_specs=pl.BlockSpec((tm, tn), lambda i, j, k: (i, j)),
        scratch_shapes=[pltpu.VMEM((tm, tn), jnp.float32)],
        compiler_params=pltpu.CompilerParams(
            dimension_semantics=("parallel", "parallel", "arbitrary")),
    )(x, w_t, b2)

    if (n_p, dout_p) != (n, dout):
        out = out[:n, :dout]
    return out


def pallas_flash_attention(qkv5, *, tq=256, tkv=512, exact_recip=True):
    """qkv5: (T, B, 3, H, D) bf16 view of the in-projection output.

    Returns:
      o   : (B, T, E) bf16   attention output (lane-dense, E = H*D)
      lse : (B, H, T, 1) f32 per-head log-sum-exp (for the weights kernel)
    """
    t, b, _, h, d = qkv5.shape
    s = t  # self-attention
    e = h * d
    tq = _pick_tile(t, tq, 8)
    tkv = _pick_tile(s, tkv, 128)

    kernel = functools.partial(_flash_attn_kernel, exact_recip=exact_recip)
    return pl.pallas_call(
        kernel,
        grid=(b, t // tq, s // tkv),
        out_shape=(
            jax.ShapeDtypeStruct((b, t, e), qkv5.dtype),
            jax.ShapeDtypeStruct((b, h, t, 1), jnp.float32),
        ),
        in_specs=[
            pl.BlockSpec((tq, None, None, h, d), lambda bi, qi, ki: (qi, bi, 0, 0, 0)),
            pl.BlockSpec((tkv, None, None, h, d), lambda bi, qi, ki: (ki, bi, 1, 0, 0)),
            pl.BlockSpec((tkv, None, None, h, d), lambda bi, qi, ki: (ki, bi, 2, 0, 0)),
        ],
        out_specs=(
            pl.BlockSpec((None, tq, e), lambda bi, qi, ki: (bi, qi, 0)),
            pl.BlockSpec((None, h, tq, 1), lambda bi, qi, ki: (bi, 0, qi, 0)),
        ),
        scratch_shapes=[
            pltpu.VMEM((h, tq, 1), jnp.float32),   # running max
            pltpu.VMEM((h, tq, 1), jnp.float32),   # running sum
            pltpu.VMEM((h, tq, d), jnp.float32),   # PV accumulator
        ],
        compiler_params=pltpu.CompilerParams(
            dimension_semantics=("parallel", "parallel", "arbitrary")),
    )(qkv5, qkv5, qkv5)


def pallas_attn_weights(qkv5, lse, num_heads, *, tq=256, tkv=512,
                        out_dtype=jnp.float32):
    """Optional (B, T, S) head-averaged attention probabilities.

    Recomputes QK^T per fully-parallel (b, q-tile, kv-tile) block and uses the
    flash pass's log-sum-exp for exact normalization; pass out_dtype=bf16 to
    halve the HBM write when exact parity is not required.
    """
    t, b, _, h, d = qkv5.shape
    s = t
    tq = _pick_tile(t, tq, 8)
    tkv = _pick_tile(s, tkv, 128)
    kernel = functools.partial(_attn_weights_kernel, inv_heads=1.0 / num_heads)
    return pl.pallas_call(
        kernel,
        grid=(b, t // tq, s // tkv),
        out_shape=jax.ShapeDtypeStruct((b, t, s), out_dtype),
        in_specs=[
            pl.BlockSpec((tq, None, None, h, d), lambda bi, qi, ki: (qi, bi, 0, 0, 0)),
            pl.BlockSpec((tkv, None, None, h, d), lambda bi, qi, ki: (ki, bi, 1, 0, 0)),
            pl.BlockSpec((None, h, tq, 1), lambda bi, qi, ki: (bi, 0, qi, 0)),
        ],
        out_specs=pl.BlockSpec((None, tq, tkv), lambda bi, qi, ki: (bi, qi, ki)),
        compiler_params=pltpu.CompilerParams(
            dimension_semantics=("parallel", "parallel", "parallel")),
    )(qkv5, qkv5, lse)


# --------------------------------------------------------------------------- module
class MultiheadAttentionPallas:
    def __init__(self, embed_dim, num_heads, key, param_dtype=jnp.bfloat16,
                 exact_softmax_recip=True):
        self.embed_dim = embed_dim
        self.num_heads = num_heads
        self.head_dim = embed_dim // num_heads
        assert self.head_dim * num_heads == embed_dim
        self.scaling = self.head_dim ** (-0.5)
        self.exact_softmax_recip = exact_softmax_recip

        k_in, k_out = jax.random.split(key)

        # in_proj_weight: torch shape (3E, E); xavier_uniform.
        bound = math.sqrt(6.0 / (embed_dim + 3 * embed_dim))
        in_proj_weight = jax.random.uniform(
            k_in, (3 * embed_dim, embed_dim), jnp.float32, -bound, bound)
        # out_proj.weight: torch shape (E, E); xavier_uniform.
        bound_o = math.sqrt(6.0 / (embed_dim + embed_dim))
        out_proj_weight = jax.random.uniform(
            k_out, (embed_dim, embed_dim), jnp.float32, -bound_o, bound_o)

        # F.linear does x @ W.T -> pre-transpose once; fold 1/sqrt(head_dim)
        # scaling into the Q output columns (and Q bias).  Note: folding the
        # scale before the bf16 cast quantizes the scaled weight (documented
        # deviation from fairseq's scale-after-projection by bf16 rounding).
        scale_vec = jnp.concatenate([
            jnp.full((embed_dim,), self.scaling, jnp.float32),
            jnp.ones((2 * embed_dim,), jnp.float32),
        ])
        w_in_t = in_proj_weight.T * scale_vec[None, :]              # (E, 3E)
        self.in_proj_w_t = w_in_t.astype(param_dtype)
        self.in_proj_b = jnp.zeros((3 * embed_dim,), jnp.float32) * scale_vec
        self.out_proj_w_t = out_proj_weight.T.astype(param_dtype)   # (E, E)
        self.out_proj_b = jnp.zeros((embed_dim,), jnp.float32)

    def __call__(self, query, need_weights=True):
        """Self-attention forward. query: (tgt_len, bsz, embed_dim)."""
        tgt_len, bsz, embed_dim = query.shape
        H, D, E = self.num_heads, self.head_dim, self.embed_dim
        assert embed_dim == E

        # --- shared in-projection (tiled bf16 matmul, bf16 output) -----------
        x2 = query.reshape(tgt_len * bsz, E)
        qkv = pallas_linear(x2, self.in_proj_w_t, self.in_proj_b,
                            out_dtype=jnp.bfloat16)               # (T*B, 3E)

        # Free view reshape: (T*B, 3E) -> (T, B, 3, H, D); attention BlockSpecs
        # pick per-(batch, q-tile / kv-tile) blocks directly (no XLA transposes).
        qkv5 = qkv.reshape(tgt_len, bsz, 3, H, D)

        # --- flash attention (online softmax over kv tiles) -------------------
        attn_bte, lse = pallas_flash_attention(
            qkv5, exact_recip=self.exact_softmax_recip)  # (B,T,E) bf16, (B,H,T,1)

        # --- out_proj (tiled bf16 matmul, f32 output) --------------------------
        out = pallas_linear(attn_bte.reshape(bsz * tgt_len, E),
                            self.out_proj_w_t, self.out_proj_b,
                            out_dtype=query.dtype)                # (B*T, E)
        # single XLA transpose of the small final output back to (T, B, E).
        attn = jnp.transpose(out.reshape(bsz, tgt_len, E), (1, 0, 2))

        attn_weights = None
        if need_weights:
            attn_weights = pallas_attn_weights(qkv5, lse, H,
                                               out_dtype=jnp.float32)
        return attn, attn_weights


# --------------------------------------------------------------------------- reference
def reference_forward(m, query):
    """Pure-JAX f32 reference of the same math (same bf16-stored weights)."""
    T, B, E = query.shape
    H, D = m.num_heads, m.head_dim
    w_in = m.in_proj_w_t.astype(jnp.float32)       # scaling already folded in
    b_in = m.in_proj_b.astype(jnp.float32)
    qkv = query.reshape(T * B, E) @ w_in + b_in
    q, k, v = jnp.split(qkv, 3, axis=-1)
    to_h = lambda t: t.reshape(T, B * H, D).transpose(1, 0, 2)
    qh, kh, vh = to_h(q), to_h(k), to_h(v)
    s = jnp.einsum("btd,bsd->bts", qh, kh)
    p = jax.nn.softmax(s, axis=-1)
    a = jnp.einsum("bts,bsd->btd", p, vh)
    attn = a.transpose(1, 0, 2).reshape(T * B, E)
    attn = attn @ m.out_proj_w_t.astype(jnp.float32) + m.out_proj_b
    attn = attn.reshape(T, B, E)
    w = p.reshape(B, H, T, T).sum(axis=1) / H
    return attn, w


# --------------------------------------------------------------------------- main
if __name__ == "__main__":
    tgt_len, bsz, embed_dim, num_heads = 8, 2, 32, 4

    root = jax.random.PRNGKey(0)
    k_param, k_x = jax.random.split(root)

    module = MultiheadAttentionPallas(embed_dim, num_heads, k_param)

    # Self-attention: query == key == value.
    query = jax.random.normal(k_x, (tgt_len, bsz, embed_dim), jnp.float32)

    attn, attn_weights = module(query, need_weights=True)
    attn = jax.block_until_ready(attn)
    attn_weights = jax.block_until_ready(attn_weights)

    # need_weights=False fast path (no (B,T,S) write at all).
    attn_nw, w_none = module(query, need_weights=False)
    attn_nw = jax.block_until_ready(attn_nw)
    assert w_none is None
    assert attn_nw.shape == (tgt_len, bsz, embed_dim)

    # Sanity check vs. pure-JAX f32 reference (bf16 MXU inputs -> relaxed tol).
    ref_attn, ref_w = reference_forward(module, query)
    np.testing.assert_allclose(np.asarray(attn), np.asarray(ref_attn),
                               rtol=3e-2, atol=3e-2)
    np.testing.assert_allclose(np.asarray(attn_weights), np.asarray(ref_w),
                               rtol=5e-2, atol=1e-2)
    assert attn.shape == (tgt_len, bsz, embed_dim)
    assert attn_weights.shape == (bsz, tgt_len, tgt_len)

    print("KERNEL_OK")
</pallas_src>

<mosaic_0001>
module attributes {stable_mosaic.version = 11 : i64} {
  func.func @_linear_kernel(%arg0: i32, %arg1: i32, %arg2: i32, %arg3: memref<16x32xbf16, #tpu.memory_space<vmem>>, %arg4: memref<32x96xbf16, #tpu.memory_space<vmem>>, %arg5: memref<1x96xf32, #tpu.memory_space<vmem>>, %arg6: memref<16x96xbf16, #tpu.memory_space<vmem>>, %arg7: memref<16x96xf32, #tpu.memory_space<vmem>>) attributes {dimension_semantics = [#tpu.dimension_semantics<parallel>, #tpu.dimension_semantics<parallel>, #tpu.dimension_semantics<arbitrary>], iteration_bounds = array<i64: 1, 1, 1>, scalar_prefetch = 0 : i64, scratch_operands = 1 : i64, tpu.core_type = #tpu.core_type<tc>, window_params = [{transform_indices = @transform_0, window_bounds = array<i64: 16, 32>}, {transform_indices = @transform_1, window_bounds = array<i64: 32, 96>}, {transform_indices = @transform_2, window_bounds = array<i64: 1, 96>}, {transform_indices = @transform_3, window_bounds = array<i64: 16, 96>}]} {
    %c0_i32 = arith.constant 0 : i32
    %0 = arith.cmpi eq, %arg2, %c0_i32 : i32
    %1 = arith.extui %0 : i1 to i32
    %c0_i32_0 = arith.constant 0 : i32
    %2 = arith.cmpi ne, %1, %c0_i32_0 : i32
    scf.if %2 {
      %c0_10 = arith.constant 0 : index
      %c0_11 = arith.constant 0 : index
      %12 = vector.load %arg5[%c0_10, %c0_11] : memref<1x96xf32, #tpu.memory_space<vmem>>, vector<1x96xf32>
      %13 = vector.shape_cast %12 : vector<1x96xf32> to vector<1x96xf32>
      %14 = vector.broadcast %13 : vector<1x96xf32> to vector<16x96xf32>
      %c0_12 = arith.constant 0 : index
      %c0_13 = arith.constant 0 : index
      %15 = vector.load %arg7[%c0_12, %c0_13] : memref<16x96xf32, #tpu.memory_space<vmem>>, vector<16x96xf32>
      tpu.vector_store %arg7[%c0_12, %c0_13], %14 {strides = array<i32>} : memref<16x96xf32, #tpu.memory_space<vmem>>, vector<16x96xf32>,
    } else {
    }
    %c0 = arith.constant 0 : index
    %c0_1 = arith.constant 0 : index
    %3 = vector.load %arg7[%c0, %c0_1] : memref<16x96xf32, #tpu.memory_space<vmem>>, vector<16x96xf32>
    %c0_2 = arith.constant 0 : index
    %c0_3 = arith.constant 0 : index
    %4 = vector.load %arg3[%c0_2, %c0_3] : memref<16x32xbf16, #tpu.memory_space<vmem>>, vector<16x32xbf16>
    %c0_4 = arith.constant 0 : index
    %c0_5 = arith.constant 0 : index
    %5 = vector.load %arg4[%c0_4, %c0_5] : memref<32x96xbf16, #tpu.memory_space<vmem>>, vector<32x96xbf16>
    %cst = arith.constant dense<0.000000e+00> : vector<16x96xf32>
    %6 = tpu.matmul %4, %5, %cst {dimension_numbers = #tpu.dot_dimension_numbers<[1], [0], [0], [1], [0, 0, 1, 1], [], []>} : vector<16x32xbf16>, vector<32x96xbf16>, vector<16x96xf32> -> vector<16x96xf32>
    %7 = arith.addf %3, %6 : vector<16x96xf32>
    %c0_6 = arith.constant 0 : index
    %c0_7 = arith.constant 0 : index
    %8 = vector.load %arg7[%c0_6, %c0_7] : memref<16x96xf32, #tpu.memory_space<vmem>>, vector<16x96xf32>
    tpu.vector_store %arg7[%c0_6, %c0_7], %7 {strides = array<i32>} : memref<16x96xf32, #tpu.memory_space<vmem>>, vector<16x96xf32>,
    %c0_i32_8 = arith.constant 0 : i32
    %9 = arith.cmpi eq, %arg2, %c0_i32_8 : i32
    %10 = arith.extui %9 : i1 to i32
    %c0_i32_9 = arith.constant 0 : i32
    %11 = arith.cmpi ne, %10, %c0_i32_9 : i32
    scf.if %11 {
      %c0_10 = arith.constant 0 : index
      %c0_11 = arith.constant 0 : index
      %12 = vector.load %arg7[%c0_10, %c0_11] : memref<16x96xf32, #tpu.memory_space<vmem>>, vector<16x96xf32>
      %13 = arith.truncf %12 : vector<16x96xf32> to vector<16x96xbf16>
      %c0_12 = arith.constant 0 : index
      %c0_13 = arith.constant 0 : index
      %14 = vector.load %arg6[%c0_12, %c0_13] : memref<16x96xbf16, #tpu.memory_space<vmem>>, vector<16x96xbf16>
      tpu.vector_store %arg6[%c0_12, %c0_13], %13 {strides = array<i32>} : memref<16x96xbf16, #tpu.memory_space<vmem>>, vector<16x96xbf16>,
    } else {
    }
    return
  }
  func.func @transform_0(%arg0: i32, %arg1: i32, %arg2: i32) -> (i32, i32) {
    %c0_i32 = arith.constant 0 : i32
    return %arg0, %arg2 : i32, i32
  }
  func.func @transform_1(%arg0: i32, %arg1: i32, %arg2: i32) -> (i32, i32) {
    %c0_i32 = arith.constant 0 : i32
    return %arg2, %arg1 : i32, i32
  }
  func.func @transform_2(%arg0: i32, %arg1: i32, %arg2: i32) -> (i32, i32) {
    %c0_i32 = arith.constant 0 : i32
    %c0_i32_0 = arith.constant 0 : i32
    return %c0_i32, %arg1 : i32, i32
  }
  func.func @transform_3(%arg0: i32, %arg1: i32, %arg2: i32) -> (i32, i32) {
    %c0_i32 = arith.constant 0 : i32
    return %arg0, %arg1 : i32, i32
  }
}

</mosaic_0001>

<bundles_post_ra>
// kernel: tpu_custom_call.1
= control target key start
LH: loop header
LB: loop body
LE: loop exit
PB: predicated region body
PF: predicated region fallthrough
CT: control target
= control target key end

     0   :  { %8 = vsyncpa [#allocation4], 0  ;;  %s315_s0 = inlined_call_operand.hbm [shape: bf16[16,32], index: 0, kind: input, shape index: {}]   ;;  %s316_s1 = inlined_call_operand.hbm [shape: bf16[32,96], index: 1, kind: input, shape index: {}]   ;;  %s317_s2 = inlined_call_operand.vmem [shape: f32[1,96], index: 2, kind: input, shape index: {}]   ;;  %s318_s3 = inlined_call_operand.hbm [shape: bf16[16,96], index: 3, kind: output, shape index: {}]  }
   0x1   :  { %9 = vsyncpa [#allocation7], 0 }
   0x2   :  { %10 = vsyncpa [#allocation5], 0  ;;  %s263_s12 = smov [#allocation3]  }
   0x3   :  { %s16_s13 = sshll.u32 %s263_s12, 4  ;;  %s17_s13 = int_to_ptr.vmem [resolvable:$true] %s16_s13 }
   0x4   :  { %s205_s14 = scalar_lea.vmem %s17_s13, 128  ;;  %p210_p1 = scmp.lt.s32.totalorder %s17_s13, %s17_s13 }
   0x5   :  { %p206_p0 = scmp.ne.s32.totalorder %s17_s13, %s205_s14  ;;  %p211_p2 = scmp.lt.s32.totalorder %s205_s14, %s205_s14 }
   0x7   :  { %p212_p3 = por %p211_p2, %p210_p1 }
   0x9   :  { %p213_p4 = pnand %p212_p3, %p206_p0 }
   0xb   :  { %216 = shalt.err (!%p213_p4)
}
   0xc   :  { %s264_s15 = smov 64   ;;  %s265_s16 = smov 4  }
   0xd   :  { %22 = dma.hbm_to_vmem [thread:$0]  %s315_s0, 128, %s17_s13, [#allocation4], %s264_s15, %s264_s15, %s265_s16  }
   0xe   :  { %s266_s19 = smov [#allocation6]  }
   0xf   :  { %s28_s20 = sshll.u32 %s266_s19, 4  ;;  %s29_s20 = int_to_ptr.vmem [resolvable:$true] %s28_s20 }
  0x10   :  { %s225_s21 = scalar_lea.vmem %s29_s20, 256  ;;  %p230_p6 = scmp.lt.s32.totalorder %s29_s20, %s29_s20 }
  0x11   :  { %p226_p5 = scmp.ne.s32.totalorder %s29_s20, %s225_s21  ;;  %p231_p7 = scmp.lt.s32.totalorder %s225_s21, %s225_s21 }
  0x13   :  { %p232_p8 = por %p231_p7, %p230_p6 }
  0x15   :  { %p233_p9 = pnand %p232_p8, %p226_p5 }
  0x17   :  { %236 = shalt.err (!%p233_p9)
}
  0x18   :  { %34 = dma.hbm_to_vmem [thread:$0]  %s316_s1, 256, %s29_s20, [#allocation7], %s264_s15, %s264_s15, %s265_s16  }
  0x19   :  { %257 = dma.done.wait [#allocation4], 128  }
  0x1a   :  { %258 = vsyncadd [#allocation4], 4294967168 }
  0x1b   :  { %259 = dma.done.wait [#allocation7], 256  }
  0x1c   :  { %260 = vsyncadd [#allocation7], 4294967040  ;;  %v267_v0 = vmov 0.0   ;;  %vm268_vm0 = vmmov 0   ;;  %v194_v1 = vld [vmem:[#allocation6 + $0x8] sm:$0xff]   ;;  %vm55_vm1 = vcmask 785408  }
  0x1d   :  { %179 = vmatprep.subr.bf16.mxu0 %v267_v0  ;;  %183 = vmatprep.mubr.msk.bf16.mxu0 %vm268_vm0, %v267_v0  ;;  %v195_v2 = vld [vmem:[#allocation6] sm:$0xff]   ;;  %v167_v3 = vld [vmem:[%s317_s2] ss:$0 sm:$0xff]  ;;  %v196_v4 = vld [vmem:[#allocation3] sm:$0xff]   ;;  %vm83_vm2 = vcmask 261120   ;;  %vm146_vm3 = vcmask 781312  }
  0x1e   :  { %180 = vmatpush3.bf16.msra.mxu0 %v194_v1  ;;  %56 = vst.msk [vmem:[#allocation2] sm:$0xff] %vm55_vm1, %v167_v3  ;;  %57 = vst.msk [vmem:[#allocation2 + $0x8] sm:$0xff] %vm55_vm1, %v167_v3  ;;  %s269_s1 = smov [#allocation8]  }
  0x1f   :  { %181 = vmatprep.subr.bf16.mxu0 %v267_v0  ;;  %s154_s2 = sshll.u32 %s269_s1, 4  ;;  %s155_s2 = int_to_ptr.vmem [resolvable:$true] %s154_s2 }
  0x20   :  { %s237_s25 = scalar_lea.vmem %s155_s2, 128  ;;  %p242_p11 = scmp.lt.s32.totalorder %s155_s2, %s155_s2 }
  0x21   :  { %p238_p10 = scmp.ne.s32.totalorder %s155_s2, %s237_s25  ;;  %p243_p12 = scmp.lt.s32.totalorder %s237_s25, %s237_s25 }
  0x22   :  { %182 = vmatpush3.bf16.msra.mxu0 %v195_v2 }
  0x23   :  { %p244_p13 = por %p243_p12, %p242_p11 }
  0x25   :  { %184 = vmatmul.mubr.msk.bf16.vlgmr.msra.gmra.mxu0 %vm83_vm2, %v196_v4  ;;  %v58_v5 = vld [vmem:[#allocation2] sm:$0xff]  ;;  %v59_v9 = vld [vmem:[#allocation2 + $0x8] sm:$0xff]  ;;  %p245_p0 = pnand %p244_p13, %p238_p10 }
  0xe5   :  { %v121_v6 = vpop.f32.mrf.mxu0 }
  0xe6   :  { %v128_v7 = vadd.f32 %v121_v6, %v58_v5 }
  0xe7   :  { %v185_v8 = vpop.f32.mrf.mxu0 }
  0xe8   :  { %131 = vst.msk [vmem:[#allocation2] sm:$0xff] %vm55_vm1, %v128_v7 }
  0xe9   :  { %v124_v10 = vpop.f32.mrf.mxu0 }
  0xea   :  { %v129_v11 = vadd.f32 %v124_v10, %v59_v9 }
  0xeb   :  { %v186_v12 = vpop.f32.mrf.mxu0 }
  0xec   :  { %132 = vst.msk [vmem:[#allocation2 + $0x8] sm:$0xff] %vm55_vm1, %v129_v11 }
  0xef   :  { %v136_v13 = vld [vmem:[#allocation2] sm:$0xff] }
  0xf0   :  { %v174_v14 = vpack.c.bf16 %v136_v13, %v136_v13 }
  0xf2   :  { %147 = vst.msk [vmem:[#allocation8] sm:$0xf] %vm146_vm3, %v174_v14 }
  0xf3   :  { %v137_v15 = vld [vmem:[#allocation2 + $0x8] sm:$0xff] }
  0xf4   :  { %v175_v16 = vpack.c.bf16 %v137_v15, %v137_v15 }
  0xf6   :  { %148 = vst.msk [vmem:[#allocation8 + $0x4] sm:$0xf] %vm146_vm3, %v175_v16 }
  0xf7   :  { %248 = shalt.err (!%p245_p0)
}
  0xf8   :  { %160 = dma.vmem_to_hbm [thread:$0]  %s155_s2, 128, %s318_s3, [#allocation5], %s264_s15, %s264_s15, %s265_s16  }
  0xf9   :  { %261 = dma.done.wait [#allocation5], 128  }
  0xfa   :  { %262 = vsyncadd [#allocation5], 4294967168 }
  0xfb   :  { %164 = vsyncpa [#allocation4], 1 }
  0xfc   :  { %165 = vsyncpa [#allocation7], 1 }
  0xfd   :  { %166 = vsyncpa [#allocation5], 1 }

</bundles_post_ra>
